<compile_context>
chip_gen: v5e
topology: v5e:2x2
jax: 0.10.0
libtpu: 0.0.40
codegen_flags: <defaults>
</compile_context>

<pallas_src>
import functools

import numpy as np
import jax
import jax.numpy as jnp
from jax import lax
from jax.experimental import pallas as pl
from jax.experimental.pallas import tpu as pltpu

_KERNEL_SIZES = (35, 65, 95, 125)


# --------------------------------- kernel -----------------------------------
def _multiscale_kernel(x_ref, wcat_ref, bcat_ref, wpw_ref, bpw_ref, o_ref, *,
                       n_conv_pad):
    # x_ref: (R, Kg) bf16 -- R row-groups, each the flattened g*(pool, W, C)
    # inputs.  Pre-cast in the wrapper: no in-kernel cast of the big operand.
    x = x_ref[...]

    # ONE MXU pass computes both the fused pool+BN+4-conv features and the
    # pool+BN residual ("skip") columns: W_cat = [W_conv | W_skip].
    y = jnp.dot(x, wcat_ref[...],
                preferred_element_type=jnp.float32) + bcat_ref[...]

    z = jnp.maximum(y[:, :n_conv_pad], 0.0).astype(jnp.bfloat16)  # ReLU (f32 compare)
    skip = y[:, n_conv_pad:]

    # 1x1 pointwise conv (block-diagonal over W positions) + bias + residual.
    out = jnp.dot(z, wpw_ref[...], preferred_element_type=jnp.float32)
    o_ref[...] = (out + bpw_ref[...] + skip).astype(o_ref.dtype)


# ------------------------- offline weight folding ---------------------------
def _fold_params(params, *, pool, wp, c_in, card, outs, g, eps=1e-5,
                 lane_align=128):
    """Fold pool + BN + convs + pointwise (block-diag) into dense matrices."""
    assert params["pw_w"].shape == (outs, 4 * card)
    w_use = wp * pool
    k_in = pool * w_use * c_in                     # flattened inputs per pooled row

    gamma = np.asarray(params["bn_gamma"], np.float64)
    beta = np.asarray(params["bn_beta"], np.float64)
    mean = np.asarray(params["bn_mean"], np.float64)
    var = np.asarray(params["bn_var"], np.float64)
    scale = gamma / np.sqrt(var + eps)
    shift = beta - mean * scale

    # S: flattened (pool, W_use, C) row group  ->  pooled + BN-scaled (Wp, C).
    S = np.zeros((k_in, wp * c_in), np.float64)
    inv = 1.0 / (pool * pool)
    ch = np.arange(c_in)
    for i in range(pool):
        for w in range(w_use):
            col = w // pool
            S[(i * w_use + w) * c_in + ch, col * c_in + ch] = scale * inv
    b_skip = np.tile(shift, wp)                                   # (wp*c_in,)

    # Toeplitz-folded "same" convs along W; all 4 branches side by side.
    Wt = np.zeros((wp * c_in, wp * 4 * card), np.float64)
    bcat = np.zeros(4 * card, np.float64)
    for b, ksz in enumerate(_KERNEL_SIZES):
        wb = np.asarray(params[f"conv{ksz}_w"], np.float64)       # (card, c_in, ksz)
        bcat[b * card:(b + 1) * card] = np.asarray(params[f"conv{ksz}_b"], np.float64)
        pad = (ksz - 1) // 2
        for wo in range(wp):
            base = wo * 4 * card + b * card
            for wi in range(wp):
                k = wi - wo + pad
                if 0 <= k < ksz:
                    Wt[wi * c_in:(wi + 1) * c_in, base:base + card] = wb[:, :, k].T
    W_conv = S @ Wt                                               # pool+BN folded in
    b_conv = np.tile(shift, wp) @ Wt + np.tile(bcat, wp)

    # 1x1 pointwise: block-diagonal over the Wp output positions.
    pw_w = np.asarray(params["pw_w"], np.float64)                 # (outs, 4*card)
    pw_b = np.asarray(params["pw_b"], np.float64)
    W_pw = np.kron(np.eye(wp), pw_w.T)                            # (wp*4*card, wp*outs)
    b_pw = np.tile(pw_b, wp)

    # Pack g pooled rows per kernel row: block-diagonal replication.
    def grp(m):
        return np.kron(np.eye(g), m)

    n_conv = g * wp * 4 * card
    lane_out = g * wp * outs
    n_conv_pad = -(-n_conv // lane_align) * lane_align   # lane-aligned split point

    w_conv_g = np.zeros((g * k_in, n_conv_pad), np.float64)
    w_conv_g[:, :n_conv] = grp(W_conv)
    b_conv_g = np.zeros(n_conv_pad, np.float64)
    b_conv_g[:n_conv] = np.tile(b_conv, g)

    # Fused first-stage matrix: [conv | skip] share the same LHS -> one matmul.
    w_cat = np.concatenate([w_conv_g, grp(S)], axis=1)   # (g*k_in, n_conv_pad+lane_out)
    b_cat = np.concatenate([b_conv_g, np.tile(b_skip, g)])

    w_pw_g = np.zeros((n_conv_pad, lane_out), np.float64)
    w_pw_g[:n_conv, :] = grp(W_pw)
    b_pw_g = np.tile(b_pw, g)

    return dict(
        w_cat=jnp.asarray(w_cat, jnp.bfloat16),
        b_cat=jnp.asarray(b_cat[None, :], jnp.float32),
        w_pw=jnp.asarray(w_pw_g, jnp.bfloat16),
        b_pw=jnp.asarray(b_pw_g[None, :], jnp.float32),
        n_conv_pad=n_conv_pad,
    )


def _pick_group(total_rows, lane_out, max_g=8, lane_target=128):
    """Smallest divisor of total_rows giving a >= lane_target-lane output.

    Capped: block-diag replication costs g^2 weight VMEM and (g-1)/g zero-block
    MXU FLOPs, so take the minimum g that yields lane-dense stores.
    """
    g = 1
    for cand in range(1, min(total_rows, max_g) + 1):
        if total_rows % cand == 0:
            g = cand
            if cand * lane_out >= lane_target:
                break
    return g


def _pick_row_block(rows_g, row_in_bytes, row_out_bytes, weight_bytes,
                    vmem_budget=48 << 20):
    """Largest legal row block fitting the VMEM budget (2x-buffered x/out,
    1x-buffered weights); prefer >= 2 grid steps so both v7x TCs get work."""
    per_row = 2 * (row_in_bytes + row_out_bytes)
    cap = max(16, (vmem_budget - weight_bytes) // max(per_row, 1))
    # Legal block heights: multiples of 16 dividing rows_g (bf16 sublane pack),
    # or the full extent for tiny inputs.
    cands = [r for r in range(16, rows_g + 1, 16) if rows_g % r == 0]
    if not cands:
        return rows_g
    fitting = [r for r in cands if r <= cap] or [cands[0]]
    multi = [r for r in fitting if rows_g // r >= 2]   # keep both v7x cores busy
    return max(multi) if multi else max(fitting)


# --------------------------------- wrapper ----------------------------------
def multiscale_block(x_nchw, params, *, pool=2):
    """x_nchw: (N, ins, H, W) float32 -> (N, outs, H//pool, W//pool)."""
    n, c_in, h, w = x_nchw.shape
    outs, four_card = params["pw_w"].shape
    card = four_card // 4
    assert outs == c_in, "residual skip requires outs == ins"

    hp, wp = h // pool, w // pool
    h_use, w_use = hp * pool, wp * pool
    total_rows = n * hp

    g = _pick_group(total_rows, wp * outs)
    pack = _fold_params(params, pool=pool, wp=wp, c_in=c_in, card=card,
                        outs=outs, g=g)
    n_conv_pad = pack["n_conv_pad"]

    # NCHW -> NHWC, crop to pooled extent, cast to bf16 (halves the HBM stream
    # of this mem-bound kernel), then flatten g pooled rows per kernel row.
    x_nhwc = jnp.transpose(x_nchw[:, :, :h_use, :w_use], (0, 2, 3, 1))
    k_in = pool * w_use * c_in
    rows_g = total_rows // g
    kg = g * k_in
    lane_out = g * wp * outs
    x_rows = x_nhwc.astype(jnp.bfloat16).reshape(rows_g, kg)

    # VMEM byte budget -> row block size and scoped-VMEM limit.
    weight_bytes = ((pack["w_cat"].size + pack["w_pw"].size) * 2
                    + (pack["b_cat"].size + pack["b_pw"].size) * 4)
    row_in_bytes, row_out_bytes = kg * 2, lane_out * 4
    r_blk = _pick_row_block(rows_g, row_in_bytes, row_out_bytes, weight_bytes)
    vmem_used = (weight_bytes
                 + 2 * r_blk * (row_in_bytes + row_out_bytes)   # pipelined x / out
                 + r_blk * (n_conv_pad + lane_out) * 6)          # y (f32) + z (bf16)
    vmem_limit = int(min(64 << 20, max(vmem_used + (8 << 20), 16 << 20)))

    kernel = functools.partial(_multiscale_kernel, n_conv_pad=n_conv_pad)

    def _const_spec(shape):
        # Grid-invariant operand: never re-DMA'd, so single-buffer it.
        return pl.BlockSpec(shape, lambda i: (0, 0),
                            pipeline_mode=pl.Buffered(1))

    out_rows = pl.pallas_call(
        kernel,
        out_shape=jax.ShapeDtypeStruct((rows_g, lane_out), x_nchw.dtype),
        grid_spec=pltpu.PrefetchScalarGridSpec(
            num_scalar_prefetch=0,
            grid=(rows_g // r_blk,),
            in_specs=[
                pl.BlockSpec((r_blk, kg), lambda i: (i, 0)),
                _const_spec(pack["w_cat"].shape),
                _const_spec(pack["b_cat"].shape),
                _const_spec(pack["w_pw"].shape),
                _const_spec(pack["b_pw"].shape),
            ],
            out_specs=pl.BlockSpec((r_blk, lane_out), lambda i: (i, 0)),
        ),
        compiler_params=pltpu.CompilerParams(
            dimension_semantics=("parallel",),
            vmem_limit_bytes=vmem_limit),
    )(x_rows, pack["w_cat"], pack["b_cat"], pack["w_pw"], pack["b_pw"])

    # (rows_g, g*wp*outs) -> (N, Hp, Wp, outs) -> NCHW.
    out = out_rows.reshape(n, hp, wp, outs)
    return jnp.transpose(out, (0, 3, 1, 2))


# --------------------------- pure-JAX reference -----------------------------
def reference(x_nchw, params, *, pool=2, eps=1e-5):
    n, c, h, w = x_nchw.shape
    scale = params["bn_gamma"] / jnp.sqrt(params["bn_var"] + eps)
    shift = params["bn_beta"] - params["bn_mean"] * scale
    xb = x_nchw * scale[None, :, None, None] + shift[None, :, None, None]
    hp, wp = h // pool, w // pool
    xp = xb[:, :, :hp * pool, :wp * pool].reshape(n, c, hp, pool, wp, pool)
    xp = xp.mean(axis=(3, 5))
    feats = []
    for ksz in _KERNEL_SIZES:
        wt = params[f"conv{ksz}_w"][:, :, None, :]        # (card, c, 1, ksz)
        pad = (ksz - 1) // 2
        y = lax.conv_general_dilated(
            xp, wt, window_strides=(1, 1), padding=((0, 0), (pad, pad)),
            dimension_numbers=("NCHW", "OIHW", "NCHW"),
            precision=lax.Precision.HIGHEST)
        feats.append(jax.nn.relu(y + params[f"conv{ksz}_b"][None, :, None, None]))
    cat = jnp.concatenate(feats, axis=1)
    out = jnp.einsum("nihw,oi->nohw", cat, params["pw_w"],
                     precision=lax.Precision.HIGHEST)
    return out + params["pw_b"][None, :, None, None] + xp


# ----------------------------------- main ------------------------------------
if __name__ == "__main__":
    N, INS, H, W = 2, 8, 16, 16
    CARD, OUTS, POOL = 4, 8, 2            # residual skip requires OUTS == INS

    key = jax.random.PRNGKey(0)
    ks = jax.random.split(key, 16)
    x = jax.random.normal(ks[0], (N, INS, H, W), jnp.float32)

    params = {
        "bn_gamma": jax.random.uniform(ks[1], (INS,), jnp.float32, 0.5, 1.5),
        "bn_beta": 0.1 * jax.random.normal(ks[2], (INS,), jnp.float32),
        "bn_mean": 0.1 * jax.random.normal(ks[3], (INS,), jnp.float32),
        "bn_var": jax.random.uniform(ks[4], (INS,), jnp.float32, 0.5, 1.5),
        "pw_w": 0.1 * jax.random.normal(ks[5], (OUTS, 4 * CARD), jnp.float32),
        "pw_b": 0.1 * jax.random.normal(ks[6], (OUTS,), jnp.float32),
    }
    for i, ksz in enumerate(_KERNEL_SIZES):
        params[f"conv{ksz}_w"] = 0.1 * jax.random.normal(
            ks[7 + 2 * i], (CARD, INS, ksz), jnp.float32)
        params[f"conv{ksz}_b"] = 0.1 * jax.random.normal(
            ks[8 + 2 * i], (CARD,), jnp.float32)

    out = jax.block_until_ready(multiscale_block(x, params, pool=POOL))
    ref = jax.block_until_ready(reference(x, params, pool=POOL))

    assert out.shape == (N, OUTS, H // POOL, W // POOL), out.shape
    # bf16 MXU operands with f32 accumulation => bf16-level gate.
    np.testing.assert_allclose(np.asarray(out), np.asarray(ref),
                               rtol=2e-2, atol=2e-2)
    print("KERNEL_OK")
</pallas_src>

<mosaic_0001>
module attributes {stable_mosaic.version = 11 : i64} {
  func.func @_multiscale_kernel(%arg0: i32, %arg1: memref<8x512xbf16, #tpu.memory_space<vmem>>, %arg2: memref<512x384xbf16, #tpu.memory_space<vmem>>, %arg3: memref<1x384xf32, #tpu.memory_space<vmem>>, %arg4: memref<256x128xbf16, #tpu.memory_space<vmem>>, %arg5: memref<1x128xf32, #tpu.memory_space<vmem>>, %arg6: memref<8x128xf32, #tpu.memory_space<vmem>>) attributes {dimension_semantics = [#tpu.dimension_semantics<parallel>], iteration_bounds = array<i64: 1>, scalar_prefetch = 0 : i64, scratch_operands = 0 : i64, tpu.core_type = #tpu.core_type<tc>, window_params = [{transform_indices = @transform_0, window_bounds = array<i64: 8, 512>}, {pipeline_mode = #tpu.pipeline_mode<synchronous>, transform_indices = @transform_1, window_bounds = array<i64: 512, 384>}, {pipeline_mode = #tpu.pipeline_mode<synchronous>, transform_indices = @transform_2, window_bounds = array<i64: 1, 384>}, {pipeline_mode = #tpu.pipeline_mode<synchronous>, transform_indices = @transform_3, window_bounds = array<i64: 256, 128>}, {pipeline_mode = #tpu.pipeline_mode<synchronous>, transform_indices = @transform_4, window_bounds = array<i64: 1, 128>}, {transform_indices = @transform_5, window_bounds = array<i64: 8, 128>}]} {
    %c0 = arith.constant 0 : index
    %c0_0 = arith.constant 0 : index
    %0 = vector.load %arg1[%c0, %c0_0] : memref<8x512xbf16, #tpu.memory_space<vmem>>, vector<8x512xbf16>
    %c0_1 = arith.constant 0 : index
    %c0_2 = arith.constant 0 : index
    %1 = vector.load %arg2[%c0_1, %c0_2] : memref<512x384xbf16, #tpu.memory_space<vmem>>, vector<512x384xbf16>
    %cst = arith.constant dense<0.000000e+00> : vector<8x384xf32>
    %2 = tpu.matmul %0, %1, %cst {dimension_numbers = #tpu.dot_dimension_numbers<[1], [0], [0], [1], [0, 0, 1, 1], [], []>} : vector<8x512xbf16>, vector<512x384xbf16>, vector<8x384xf32> -> vector<8x384xf32>
    %c0_3 = arith.constant 0 : index
    %c0_4 = arith.constant 0 : index
    %3 = vector.load %arg3[%c0_3, %c0_4] : memref<1x384xf32, #tpu.memory_space<vmem>>, vector<1x384xf32>
    %4 = vector.broadcast %3 : vector<1x384xf32> to vector<8x384xf32>
    %5 = arith.addf %2, %4 : vector<8x384xf32>
    %6 = vector.extract_strided_slice %5 {offsets = [0, 0], sizes = [8, 256], strides = [1, 1]} : vector<8x384xf32> to vector<8x256xf32>
    %cst_5 = arith.constant 0.000000e+00 : f32
    %7 = vector.broadcast %cst_5 : f32 to vector<8x256xf32>
    %8 = arith.maximumf %6, %7 : vector<8x256xf32>
    %9 = arith.truncf %8 : vector<8x256xf32> to vector<8x256xbf16>
    %10 = vector.extract_strided_slice %5 {offsets = [0, 256], sizes = [8, 128], strides = [1, 1]} : vector<8x384xf32> to vector<8x128xf32>
    %c0_6 = arith.constant 0 : index
    %c0_7 = arith.constant 0 : index
    %11 = vector.load %arg4[%c0_6, %c0_7] : memref<256x128xbf16, #tpu.memory_space<vmem>>, vector<256x128xbf16>
    %cst_8 = arith.constant dense<0.000000e+00> : vector<8x128xf32>
    %12 = tpu.matmul %9, %11, %cst_8 {dimension_numbers = #tpu.dot_dimension_numbers<[1], [0], [0], [1], [0, 0, 1, 1], [], []>} : vector<8x256xbf16>, vector<256x128xbf16>, vector<8x128xf32> -> vector<8x128xf32>
    %c0_9 = arith.constant 0 : index
    %c0_10 = arith.constant 0 : index
    %13 = vector.load %arg5[%c0_9, %c0_10] : memref<1x128xf32, #tpu.memory_space<vmem>>, vector<1x128xf32>
    %14 = vector.broadcast %13 : vector<1x128xf32> to vector<8x128xf32>
    %15 = arith.addf %12, %14 : vector<8x128xf32>
    %16 = arith.addf %15, %10 : vector<8x128xf32>
    %c0_11 = arith.constant 0 : index
    %c0_12 = arith.constant 0 : index
    %17 = vector.load %arg6[%c0_11, %c0_12] : memref<8x128xf32, #tpu.memory_space<vmem>>, vector<8x128xf32>
    tpu.vector_store %arg6[%c0_11, %c0_12], %16 {strides = array<i32>} : memref<8x128xf32, #tpu.memory_space<vmem>>, vector<8x128xf32>,
    return
  }
  func.func @transform_0(%arg0: i32) -> (i32, i32) {
    %c0_i32 = arith.constant 0 : i32
    %c0_i32_0 = arith.constant 0 : i32
    return %arg0, %c0_i32 : i32, i32
  }
  func.func @transform_1(%arg0: i32) -> (i32, i32) {
    %c0_i32 = arith.constant 0 : i32
    %c0_i32_0 = arith.constant 0 : i32
    %c0_i32_1 = arith.constant 0 : i32
    return %c0_i32, %c0_i32_0 : i32, i32
  }
  func.func @transform_2(%arg0: i32) -> (i32, i32) {
    %c0_i32 = arith.constant 0 : i32
    %c0_i32_0 = arith.constant 0 : i32
    %c0_i32_1 = arith.constant 0 : i32
    return %c0_i32, %c0_i32_0 : i32, i32
  }
  func.func @transform_3(%arg0: i32) -> (i32, i32) {
    %c0_i32 = arith.constant 0 : i32
    %c0_i32_0 = arith.constant 0 : i32
    %c0_i32_1 = arith.constant 0 : i32
    return %c0_i32, %c0_i32_0 : i32, i32
  }
  func.func @transform_4(%arg0: i32) -> (i32, i32) {
    %c0_i32 = arith.constant 0 : i32
    %c0_i32_0 = arith.constant 0 : i32
    %c0_i32_1 = arith.constant 0 : i32
    return %c0_i32, %c0_i32_0 : i32, i32
  }
  func.func @transform_5(%arg0: i32) -> (i32, i32) {
    %c0_i32 = arith.constant 0 : i32
    %c0_i32_0 = arith.constant 0 : i32
    return %arg0, %c0_i32 : i32, i32
  }
}

</mosaic_0001>

<bundles_post_ra>
// kernel: tpu_custom_call.1
= control target key start
LH: loop header
LB: loop body
LE: loop exit
PB: predicated region body
PF: predicated region fallthrough
CT: control target
= control target key end

     0   :  { %10 = vsyncpa [#allocation3], 0  ;;  %s1858_s0 = inlined_call_operand.hbm [shape: bf16[8,512], index: 0, kind: input, shape index: {}]   ;;  %s1859_s1 = inlined_call_operand.hbm [shape: bf16[512,384], index: 1, kind: input, shape index: {}]   ;;  %s1860_s2 = inlined_call_operand.hbm [shape: f32[1,384], index: 2, kind: input, shape index: {}]   ;;  %s1861_s3 = inlined_call_operand.hbm [shape: bf16[256,128], index: 3, kind: input, shape index: {}]   ;;  %s1862_s4 = inlined_call_operand.vmem [shape: f32[1,128], index: 4, kind: input, shape index: {}]   ;;  %s1863_s5 = inlined_call_operand.hbm [shape: f32[8,128], index: 5, kind: output, shape index: {}]  }
   0x1   :  { %11 = vsyncpa [#allocation6], 0 }
   0x2   :  { %12 = vsyncpa [#allocation9], 0  ;;  %s29_s20 = sshll.u32 %s1859_s1, 4  ;;  %s30_s20 = int_to_ptr.hbm [resolvable:$true] %s29_s20 }
   0x3   :  { %13 = vsyncpa [#allocation4], 0  ;;  %s1781_s21 = smov [#allocation5]   ;;  %s19_s25 = sshll.u32 %s1858_s0, 4  ;;  %s20_s25 = int_to_ptr.hbm [resolvable:$true] %s19_s25 }
   0x4   :  { %s31_s22 = sshll.u32 %s1781_s21, 4  ;;  %s1782_s26 = smov 192   ;;  %s32_s22 = int_to_ptr.vmem [resolvable:$true] %s31_s22 }
   0x5   :  { %s1783_s27 = smov 12   ;;  %s1784_s28 = smov [#allocation2]  }
   0x6   :  { %37 = dma.hbm_to_vmem [thread:$0]  %s30_s20, 12288, %s32_s22, [#allocation6], %s1782_s26, %s1782_s26, %s1783_s27  }
   0x7   :  { %s21_s29 = sshll.u32 %s1784_s28, 4  ;;  %s43_s7 = sshll.u32 %s1860_s2, 4  ;;  %s22_s29 = int_to_ptr.vmem [resolvable:$true] %s21_s29  ;;  %s44_s7 = int_to_ptr.hbm [resolvable:$true] %s43_s7 }
   0x8   :  { %24 = dma.hbm_to_vmem [thread:$0]  %s20_s25, 256, %s22_s29, [#allocation3]  }
   0x9   :  { %s53_s9 = sshll.u32 %s1861_s3, 4  ;;  %s1785_s10 = smov [#allocation7]   ;;  %s54_s9 = int_to_ptr.hbm [resolvable:$true] %s53_s9 }
   0xa   :  { %s45_s11 = sshll.u32 %s1785_s10, 4  ;;  %s1786_s0 = smov [#allocation8]   ;;  %s46_s11 = int_to_ptr.vmem [resolvable:$true] %s45_s11 }
   0xb   :  { %48 = dma.hbm_to_vmem [thread:$0]  %s44_s7, 48, %s46_s11, [#allocation6]  }
   0xc   :  { %s55_s12 = sshll.u32 %s1786_s0, 4  ;;  %s1787_s13 = smov 64   ;;  %s56_s12 = int_to_ptr.vmem [resolvable:$true] %s55_s12 }
   0xd   :  { %s1788_s14 = smov 4  }
   0xe   :  { %61 = dma.hbm_to_vmem [thread:$0]  %s54_s9, 2048, %s56_s12, [#allocation9], %s1787_s13, %s1787_s13, %s1788_s14  }
   0xf   :  { %1773 = dma.done.wait [#allocation3], 256  }
  0x10   :  { %1774 = vsyncadd [#allocation3], 4294967040 }
  0x11   :  { %1775 = dma.done.wait [#allocation6], 12336  }
  0x12   :  { %1776 = vsyncadd [#allocation6], 4294954960 }
  0x13   :  { %1777 = dma.done.wait [#allocation9], 2048  }
  0x14   :  { %1778 = vsyncadd [#allocation9], 4294965248  ;;  %v1169_v0 = vld [vmem:[#allocation5 + $0xa8] sm:$0xf]  ;;  %v1553_v1 = vld [vmem:[#allocation5 + $0xb0] sm:$0xf0] }
  0x15   :  { %v1265_v2 = vld [vmem:[#allocation5 + $0x168] sm:$0xf]  ;;  %v1170_v3 = vor.u32 %v1553_v1, %v1169_v0  ;;  %v1577_v4 = vld [vmem:[#allocation5 + $0x170] sm:$0xf0]  ;;  %v1157_v11 = vld [vmem:[#allocation5 + $0x90] sm:$0xf] }
  0x16   :  { %v1361_v5 = vld [vmem:[#allocation5 + $0x228] sm:$0xf]  ;;  %v1601_v6 = vld [vmem:[#allocation5 + $0x230] sm:$0xf0]  ;;  %v1266_v7 = vor.u32 %v1577_v4, %v1265_v2  ;;  %v1550_v13 = vld [vmem:[#allocation5 + $0x98] sm:$0xf0] }
  0x17   :  { %v1362_v8 = vor.u32 %v1601_v6, %v1361_v5  ;;  %v1457_v9 = vld [vmem:[#allocation5 + $0x2e8] sm:$0xf]  ;;  %v1625_v10 = vld [vmem:[#allocation5 + $0x2f0] sm:$0xf0]  ;;  %744 = vmatpush.bf16.msra.mxu0 %v1170_v3  ;;  %v1253_v14 = vld [vmem:[#allocation5 + $0x150] sm:$0xf]  ;;  %v1158_v16 = vor.u32 %v1550_v13, %v1157_v11 }
  0x18   :  { %v1458_v12 = vor.u32 %v1625_v10, %v1457_v9  ;;  %v1574_v15 = vld [vmem:[#allocation5 + $0x158] sm:$0xf0]  ;;  %757 = vmatpush.bf16.msra.mxu1 %v1266_v7  ;;  %v1349_v18 = vld [vmem:[#allocation5 + $0x210] sm:$0xf]  ;;  %v1145_v23 = vld [vmem:[#allocation5 + $0x78] sm:$0xf] }
  0x19   :  { %770 = vmatpush.bf16.msra.mxu2 %v1362_v8  ;;  %v1254_v17 = vor.u32 %v1574_v15, %v1253_v14  ;;  %v1598_v19 = vld [vmem:[#allocation5 + $0x218] sm:$0xf0]  ;;  %v1445_v20 = vld [vmem:[#allocation5 + $0x2d0] sm:$0xf]  ;;  %v1547_v24 = vld [vmem:[#allocation5 + $0x80] sm:$0xf0] }
  0x1a   :  { %783 = vmatpush.bf16.msra.mxu3 %v1458_v12  ;;  %v1350_v21 = vor.u32 %v1598_v19, %v1349_v18  ;;  %v1622_v22 = vld [vmem:[#allocation5 + $0x2d8] sm:$0xf0]  ;;  %v1241_v26 = vld [vmem:[#allocation5 + $0x138] sm:$0xf]  ;;  %v1571_v27 = vld [vmem:[#allocation5 + $0x140] sm:$0xf0]  ;;  %v1146_v29 = vor.u32 %v1547_v24, %v1145_v23 }
  0x1b   :  { %v1446_v25 = vor.u32 %v1622_v22, %v1445_v20  ;;  %v1337_v28 = vld [vmem:[#allocation5 + $0x1f8] sm:$0xf]  ;;  %745 = vmatpush.bf16.msra.mxu0 %v1158_v16  ;;  %v1595_v30 = vld [vmem:[#allocation5 + $0x200] sm:$0xf0]  ;;  %v1242_v33 = vor.u32 %v1571_v27, %v1241_v26  ;;  %v1133_v35 = vld [vmem:[#allocation5 + $0x60] sm:$0xf] }
  0x1c   :  { %v1433_v31 = vld [vmem:[#allocation5 + $0x2b8] sm:$0xf]  ;;  %v1619_v32 = vld [vmem:[#allocation5 + $0x2c0] sm:$0xf0]  ;;  %758 = vmatpush.bf16.msra.mxu1 %v1254_v17  ;;  %v1338_v34 = vor.u32 %v1595_v30, %v1337_v28  ;;  %v1544_v36 = vld [vmem:[#allocation5 + $0x68] sm:$0xf0] }
  0x1d   :  { %771 = vmatpush.bf16.msra.mxu2 %v1350_v21  ;;  %v1229_v37 = vld [vmem:[#allocation5 + $0x120] sm:$0xf]  ;;  %v1434_v38 = vor.u32 %v1619_v32, %v1433_v31  ;;  %v1568_v39 = vld [vmem:[#allocation5 + $0x128] sm:$0xf0]  ;;  %v1134_v44 = vor.u32 %v1544_v36, %v1133_v35  ;;  %v1121_v47 = vld [vmem:[#allocation5 + $0x48] sm:$0xf] }
  0x1e   :  { %784 = vmatpush.bf16.msra.mxu3 %v1446_v25  ;;  %v1325_v40 = vld [vmem:[#allocation5 + $0x1e0] sm:$0xf]  ;;  %v1592_v41 = vld [vmem:[#allocation5 + $0x1e8] sm:$0xf0]  ;;  %v1230_v45 = vor.u32 %v1568_v39, %v1229_v37  ;;  %v1541_v48 = vld [vmem:[#allocation5 + $0x50] sm:$0xf0] }
  0x1f   :  { %v1421_v42 = vld [vmem:[#allocation5 + $0x2a0] sm:$0xf]  ;;  %v1616_v43 = vld [vmem:[#allocation5 + $0x2a8] sm:$0xf0]  ;;  %746 = vmatpush.bf16.msra.mxu0 %v1146_v29  ;;  %v1326_v46 = vor.u32 %v1592_v41, %v1325_v40  ;;  %v1217_v49 = vld [vmem:[#allocation5 + $0x108] sm:$0xf]  ;;  %v1122_v56 = vor.u32 %v1541_v48, %v1121_v47 }
  0x20   :  { %759 = vmatpush.bf16.msra.mxu1 %v1242_v33  ;;  %v1422_v50 = vor.u32 %v1616_v43, %v1421_v42  ;;  %v1565_v51 = vld [vmem:[#allocation5 + $0x110] sm:$0xf0]  ;;  %v1313_v52 = vld [vmem:[#allocation5 + $0x1c8] sm:$0xf]  ;;  %v1109_v59 = vld [vmem:[#allocation5 + $0x30] sm:$0xf] }
  0x21   :  { %772 = vmatpush.bf16.msra.mxu2 %v1338_v34  ;;  %v1589_v53 = vld [vmem:[#allocation5 + $0x1d0] sm:$0xf0]  ;;  %v1409_v54 = vld [vmem:[#allocation5 + $0x288] sm:$0xf]  ;;  %v1218_v57 = vor.u32 %v1565_v51, %v1217_v49  ;;  %v1538_v60 = vld [vmem:[#allocation5 + $0x38] sm:$0xf0] }
  0x22   :  { %785 = vmatpush.bf16.msra.mxu3 %v1434_v38  ;;  %v1613_v55 = vld [vmem:[#allocation5 + $0x290] sm:$0xf0]  ;;  %v1314_v58 = vor.u32 %v1589_v53, %v1313_v52  ;;  %v1205_v61 = vld [vmem:[#allocation5 + $0xf0] sm:$0xf]  ;;  %v1562_v63 = vld [vmem:[#allocation5 + $0xf8] sm:$0xf0]  ;;  %v1110_v4 = vor.u32 %v1538_v60, %v1109_v59 }
  0x23   :  { %747 = vmatpush.bf16.msra.mxu0 %v1134_v44  ;;  %v1410_v62 = vor.u32 %v1613_v55, %v1409_v54  ;;  %v1301_v0 = vld [vmem:[#allocation5 + $0x1b0] sm:$0xf]  ;;  %v1586_v1 = vld [vmem:[#allocation5 + $0x1b8] sm:$0xf0]  ;;  %v1206_v5 = vor.u32 %v1562_v63, %v1205_v61  ;;  %v1097_v7 = vld [vmem:[#allocation5 + $0x18] sm:$0xf] }
  0x24   :  { %760 = vmatpush.bf16.msra.mxu1 %v1230_v45  ;;  %v1397_v2 = vld [vmem:[#allocation5 + $0x270] sm:$0xf]  ;;  %v1610_v3 = vld [vmem:[#allocation5 + $0x278] sm:$0xf0]  ;;  %v1302_v6 = vor.u32 %v1586_v1, %v1301_v0  ;;  %v1535_v8 = vld [vmem:[#allocation5 + $0x20] sm:$0xf0] }
  0x25   :  { %773 = vmatpush.bf16.msra.mxu2 %v1326_v46  ;;  %v1193_v9 = vld [vmem:[#allocation5 + $0xd8] sm:$0xf]  ;;  %v1398_v10 = vor.u32 %v1610_v3, %v1397_v2  ;;  %v1559_v11 = vld [vmem:[#allocation5 + $0xe0] sm:$0xf0]  ;;  %v1098_v16 = vor.u32 %v1535_v8, %v1097_v7  ;;  %v1085_v17 = vld [vmem:[#allocation5] sm:$0xf] }
  0x26   :  { %786 = vmatpush.bf16.msra.mxu3 %v1422_v50  ;;  %v1289_v12 = vld [vmem:[#allocation5 + $0x198] sm:$0xf]  ;;  %v1583_v13 = vld [vmem:[#allocation5 + $0x1a0] sm:$0xf0]  ;;  %v1532_v18 = vld [vmem:[#allocation5 + $0x8] sm:$0xf0]  ;;  %v1194_v20 = vor.u32 %v1559_v11, %v1193_v9 }
  0x27   :  { %748 = vmatpush.bf16.msra.mxu0 %v1122_v56  ;;  %v1385_v14 = vld [vmem:[#allocation5 + $0x258] sm:$0xf]  ;;  %v1607_v15 = vld [vmem:[#allocation5 + $0x260] sm:$0xf0]  ;;  %v1181_v19 = vld [vmem:[#allocation5 + $0xc0] sm:$0xf]  ;;  %v1290_v21 = vor.u32 %v1583_v13, %v1289_v12  ;;  %v1086_v32 = vor.u32 %v1532_v18, %v1085_v17 }
  0x28   :  { %761 = vmatpush.bf16.msra.mxu1 %v1218_v57  ;;  %v1556_v22 = vld [vmem:[#allocation5 + $0xc8] sm:$0xf0]  ;;  %v1277_v23 = vld [vmem:[#allocation5 + $0x180] sm:$0xf]  ;;  %v1386_v25 = vor.u32 %v1607_v15, %v1385_v14  ;;  %v1171_v29 = vld [vmem:[#allocation5 + $0xb4] sm:$0xf0] }
  0x29   :  { %774 = vmatpush.bf16.msra.mxu2 %v1314_v58  ;;  %v1580_v24 = vld [vmem:[#allocation5 + $0x188] sm:$0xf0]  ;;  %v1373_v26 = vld [vmem:[#allocation5 + $0x240] sm:$0xf]  ;;  %v81_v31 = vld [vmem:[#allocation2 + $0x8] sm:$0xff]  ;;  %v1182_v37 = vor.u32 %v1556_v22, %v1181_v19  ;;  %s1789_s15 = smov [#allocation10]  }
  0x2a   :  { %787 = vmatpush.bf16.msra.mxu3 %v1410_v62  ;;  %v1604_v27 = vld [vmem:[#allocation5 + $0x248] sm:$0xf0]  ;;  %v1267_v33 = vld [vmem:[#allocation5 + $0x174] sm:$0xf0]  ;;  %v222_v36 = vunpack.c.l.b16 %v81_v31  ;;  %v1278_v38 = vor.u32 %v1580_v24, %v1277_v23  ;;  %v223_v41 = vunpack.c.h.b16 %v81_v31  ;;  %v80_v44 = vld [vmem:[#allocation2] sm:$0xff]  ;;  %s1069_s16 = sshll.u32 %s1789_s15, 4  ;;  %s1070_s16 = int_to_ptr.vmem [resolvable:$true] %s1069_s16 }
  0x2b   :  { %749 = vmatpush.bf16.msra.mxu0 %v1110_v4  ;;  %v1552_v28 = vld [vmem:[#allocation5 + $0xac] sm:$0xf]  ;;  %v1363_v35 = vld [vmem:[#allocation5 + $0x234] sm:$0xf0]  ;;  %v1374_v42 = vor.u32 %v1604_v27, %v1373_v26  ;;  %v1549_v47 = vld [vmem:[#allocation5 + $0x94] sm:$0xf]  ;;  %v220_v50 = vunpack.c.l.b16 %v80_v44  ;;  %v221_v51 = vunpack.c.h.b16 %v80_v44 }
  0x2c   :  { %762 = vmatpush.bf16.msra.mxu1 %v1206_v5  ;;  %v1576_v30 = vld [vmem:[#allocation5 + $0x16c] sm:$0xf]  ;;  %v1459_v40 = vld [vmem:[#allocation5 + $0x2f4] sm:$0xf0]  ;;  %v1174_v43 = vor.u32 %v1552_v28, %v1171_v29  ;;  %v1159_v48 = vld [vmem:[#allocation5 + $0x9c] sm:$0xf0]  ;;  %v1832_v56 = vpack.c.b16 %v222_v36, %v222_v36  ;;  %v1836_v60 = vpack.c.b16 %v223_v41, %v223_v41 }
  0x2d   :  { %775 = vmatpush.bf16.msra.mxu2 %v1302_v6  ;;  %v1600_v34 = vld [vmem:[#allocation5 + $0x22c] sm:$0xf]  ;;  %v1270_v45 = vor.u32 %v1576_v30, %v1267_v33  ;;  %v1573_v49 = vld [vmem:[#allocation5 + $0x154] sm:$0xf]  ;;  %v1255_v53 = vld [vmem:[#allocation5 + $0x15c] sm:$0xf0]  ;;  %v1834_v59 = vpack.c.b16 %v220_v50, %v220_v50  ;;  %v1162_v61 = vor.u32 %v1549_v47, %v1159_v48  ;;  %v1838_v62 = vpack.c.b16 %v221_v51, %v221_v51 }
  0x2e   :  { %788 = vmatpush.bf16.msra.mxu3 %v1398_v10  ;;  %v1624_v39 = vld [vmem:[#allocation5 + $0x2ec] sm:$0xf]  ;;  %v1366_v46 = vor.u32 %v1600_v34, %v1363_v35  ;;  %v1597_v54 = vld [vmem:[#allocation5 + $0x214] sm:$0xf]  ;;  %v1351_v55 = vld [vmem:[#allocation5 + $0x21c] sm:$0xf0]  ;;  %v1258_v63 = vor.u32 %v1573_v49, %v1255_v53 }
  0x2f   :  { %750 = vmatpush.bf16.msra.mxu0 %v1098_v16  ;;  %v1462_v52 = vor.u32 %v1624_v39, %v1459_v40  ;;  %v1621_v57 = vld [vmem:[#allocation5 + $0x2d4] sm:$0xf]  ;;  %v1447_v58 = vld [vmem:[#allocation5 + $0x2dc] sm:$0xf0]  ;;  %v1354_v0 = vor.u32 %v1597_v54, %v1351_v55  ;;  %v1546_v1 = vld [vmem:[#allocation5 + $0x7c] sm:$0xf] }
  0x30   :  { %763 = vmatpush.bf16.msra.mxu1 %v1194_v20  ;;  %v1147_v2 = vld [vmem:[#allocation5 + $0x84] sm:$0xf0]  ;;  %v1570_v3 = vld [vmem:[#allocation5 + $0x13c] sm:$0xf]  ;;  %v1450_v4 = vor.u32 %v1621_v57, %v1447_v58  ;;  %v1543_v13 = vld [vmem:[#allocation5 + $0x64] sm:$0xf] }
  0x31   :  { %776 = vmatpush.bf16.msra.mxu2 %v1290_v21  ;;  %v1243_v5 = vld [vmem:[#allocation5 + $0x144] sm:$0xf0]  ;;  %v1594_v6 = vld [vmem:[#allocation5 + $0x1fc] sm:$0xf]  ;;  %v1150_v10 = vor.u32 %v1546_v1, %v1147_v2  ;;  %v1135_v14 = vld [vmem:[#allocation5 + $0x6c] sm:$0xf0] }
  0x32   :  { %789 = vmatpush.bf16.msra.mxu3 %v1386_v25  ;;  %v1339_v7 = vld [vmem:[#allocation5 + $0x204] sm:$0xf0]  ;;  %v1618_v8 = vld [vmem:[#allocation5 + $0x2bc] sm:$0xf]  ;;  %v1246_v11 = vor.u32 %v1570_v3, %v1243_v5  ;;  %v1567_v15 = vld [vmem:[#allocation5 + $0x124] sm:$0xf]  ;;  %v1138_v22 = vor.u32 %v1543_v13, %v1135_v14 }
  0x33   :  { %751 = vmatpush.bf16.msra.mxu0 %v1086_v32  ;;  %v1435_v9 = vld [vmem:[#allocation5 + $0x2c4] sm:$0xf0]  ;;  %v1342_v12 = vor.u32 %v1594_v6, %v1339_v7  ;;  %v1231_v17 = vld [vmem:[#allocation5 + $0x12c] sm:$0xf0]  ;;  %v1591_v18 = vld [vmem:[#allocation5 + $0x1e4] sm:$0xf] }
  0x34   :  { %764 = vmatpush.bf16.msra.mxu1 %v1182_v37  ;;  %v1438_v16 = vor.u32 %v1618_v8, %v1435_v9  ;;  %v1327_v19 = vld [vmem:[#allocation5 + $0x1ec] sm:$0xf0]  ;;  %v1615_v20 = vld [vmem:[#allocation5 + $0x2a4] sm:$0xf]  ;;  %v1234_v23 = vor.u32 %v1567_v15, %v1231_v17  ;;  %v1540_v25 = vld [vmem:[#allocation5 + $0x4c] sm:$0xf] }
  0x35   :  { %777 = vmatpush.bf16.msra.mxu2 %v1278_v38  ;;  %v1423_v21 = vld [vmem:[#allocation5 + $0x2ac] sm:$0xf0]  ;;  %v1330_v24 = vor.u32 %v1591_v18, %v1327_v19  ;;  %v1123_v26 = vld [vmem:[#allocation5 + $0x54] sm:$0xf0]  ;;  %v1564_v27 = vld [vmem:[#allocation5 + $0x10c] sm:$0xf] }
  0x36   :  { %790 = vmatpush.bf16.msra.mxu3 %v1374_v42  ;;  %752 = vmatmul.bf16.vlgmr.msra.gmra.mxu0 %v1834_v59  ;;  %v1426_v28 = vor.u32 %v1615_v20, %v1423_v21  ;;  %v1219_v29 = vld [vmem:[#allocation5 + $0x114] sm:$0xf0]  ;;  %v1588_v30 = vld [vmem:[#allocation5 + $0x1cc] sm:$0xf]  ;;  %v1126_v34 = vor.u32 %v1540_v25, %v1123_v26  ;;  %v1537_v35 = vld [vmem:[#allocation5 + $0x34] sm:$0xf] }
  0x37   :  { %796 = vmatpush.bf16.msrb.mxu0 %v1174_v43  ;;  %765 = vmatmul.bf16.vlgmr.msra.gmra.mxu1 %v1838_v62  ;;  %v1315_v31 = vld [vmem:[#allocation5 + $0x1d4] sm:$0xf0]  ;;  %v1612_v32 = vld [vmem:[#allocation5 + $0x28c] sm:$0xf]  ;;  %v1222_v36 = vor.u32 %v1564_v27, %v1219_v29  ;;  %v1111_v38 = vld [vmem:[#allocation5 + $0x3c] sm:$0xf0] }
  0x38   :  { %809 = vmatpush.bf16.msrb.mxu1 %v1270_v45  ;;  %778 = vmatmul.bf16.vlgmr.msra.gmra.mxu2 %v1832_v56  ;;  %v1411_v33 = vld [vmem:[#allocation5 + $0x294] sm:$0xf0]  ;;  %v1318_v37 = vor.u32 %v1588_v30, %v1315_v31  ;;  %v1561_v39 = vld [vmem:[#allocation5 + $0xf4] sm:$0xf]  ;;  %v1207_v41 = vld [vmem:[#allocation5 + $0xfc] sm:$0xf0] }
  0x39   :  { %822 = vmatpush.bf16.msrb.mxu2 %v1366_v46  ;;  %791 = vmatmul.bf16.vlgmr.msra.gmra.mxu3 %v1836_v60  ;;  %v1414_v40 = vor.u32 %v1612_v32, %v1411_v33  ;;  %v1585_v42 = vld [vmem:[#allocation5 + $0x1b4] sm:$0xf]  ;;  %v1303_v43 = vld [vmem:[#allocation5 + $0x1bc] sm:$0xf0]  ;;  %v1114_v46 = vor.u32 %v1537_v35, %v1111_v38  ;;  %v1210_v47 = vor.u32 %v1561_v39, %v1207_v41  ;;  %v1534_v49 = vld [vmem:[#allocation5 + $0x1c] sm:$0xf] }
  0x3a   :  { %835 = vmatpush.bf16.msrb.mxu3 %v1462_v52  ;;  %v1609_v44 = vld [vmem:[#allocation5 + $0x274] sm:$0xf]  ;;  %v1399_v45 = vld [vmem:[#allocation5 + $0x27c] sm:$0xf0]  ;;  %v1306_v48 = vor.u32 %v1585_v42, %v1303_v43  ;;  %v1099_v50 = vld [vmem:[#allocation5 + $0x24] sm:$0xf0] }
  0x3b   :  { %797 = vmatpush.bf16.msrb.mxu0 %v1162_v61  ;;  %v1558_v51 = vld [vmem:[#allocation5 + $0xdc] sm:$0xf]  ;;  %v1402_v52 = vor.u32 %v1609_v44, %v1399_v45  ;;  %v1195_v53 = vld [vmem:[#allocation5 + $0xe4] sm:$0xf0]  ;;  %v1102_v61 = vor.u32 %v1534_v49, %v1099_v50  ;;  %v1087_v2 = vld [vmem:[#allocation5 + $0xc] sm:$0xf0] }
  0x3c   :  { %810 = vmatpush.bf16.msrb.mxu1 %v1258_v63  ;;  %v1582_v54 = vld [vmem:[#allocation5 + $0x19c] sm:$0xf]  ;;  %v1291_v55 = vld [vmem:[#allocation5 + $0x1a4] sm:$0xf0]  ;;  %v1531_v63 = vld [vmem:[#allocation5 + $0x4] sm:$0xf] }
  0x3d   :  { %823 = vmatpush.bf16.msrb.mxu2 %v1354_v0  ;;  %v1606_v57 = vld [vmem:[#allocation5 + $0x25c] sm:$0xf]  ;;  %v1387_v58 = vld [vmem:[#allocation5 + $0x264] sm:$0xf0]  ;;  %v1198_v0 = vor.u32 %v1558_v51, %v1195_v53  ;;  %v1294_v1 = vor.u32 %v1582_v54, %v1291_v55  ;;  %v1555_v3 = vld [vmem:[#allocation5 + $0xc4] sm:$0xf] }
  0x3e   :  { %836 = vmatpush.bf16.msrb.mxu3 %v1450_v4  ;;  %v1183_v4 = vld [vmem:[#allocation5 + $0xcc] sm:$0xf0]  ;;  %v1390_v5 = vor.u32 %v1606_v57, %v1387_v58  ;;  %v1579_v6 = vld [vmem:[#allocation5 + $0x184] sm:$0xf]  ;;  %v1578_v14 = vld [vmem:[#allocation5 + $0x178] sm:$0xf0] }
  0x3f   :  { %798 = vmatpush.bf16.msrb.mxu0 %v1150_v10  ;;  %v1279_v7 = vld [vmem:[#allocation5 + $0x18c] sm:$0xf0]  ;;  %v1603_v8 = vld [vmem:[#allocation5 + $0x244] sm:$0xf]  ;;  %v1186_v15 = vor.u32 %v1555_v3, %v1183_v4  ;;  %v1165_v19 = vld [vmem:[#allocation5 + $0x98] sm:$0xf] }
  0x40   :  { %811 = vmatpush.bf16.msrb.mxu1 %v1246_v11  ;;  %v1375_v9 = vld [vmem:[#allocation5 + $0x24c] sm:$0xf0]  ;;  %v1554_v11 = vld [vmem:[#allocation5 + $0xb8] sm:$0xf0]  ;;  %v1551_v20 = vld [vmem:[#allocation5 + $0xa0] sm:$0xf0] }
  0x41   :  { %824 = vmatpush.bf16.msrb.mxu2 %v1342_v12  ;;  %v1177_v10 = vld [vmem:[#allocation5 + $0xb0] sm:$0xf]  ;;  %v1090_v12 = vor.u32 %v1531_v63, %v1087_v2  ;;  %v1378_v17 = vor.u32 %v1603_v8, %v1375_v9  ;;  %v1602_v25 = vld [vmem:[#allocation5 + $0x238] sm:$0xf0]  ;;  %v1166_v27 = vor.u32 %v1551_v20, %v1165_v19  ;;  %v1548_v29 = vld [vmem:[#allocation5 + $0x88] sm:$0xf0] }
  0x42   :  { %837 = vmatpush.bf16.msrb.mxu3 %v1438_v16  ;;  %v1273_v13 = vld [vmem:[#allocation5 + $0x170] sm:$0xf]  ;;  %v1282_v16 = vor.u32 %v1579_v6, %v1279_v7  ;;  %v1178_v18 = vor.u32 %v1554_v11, %v1177_v10  ;;  %v1249_v31 = vld [vmem:[#allocation5 + $0x140] sm:$0xf]  ;;  %v1626_v33 = vld [vmem:[#allocation5 + $0x2f8] sm:$0xf0] }
  0x43   :  { %799 = vmatpush.bf16.msrb.mxu0 %v1138_v22  ;;  %v1274_v21 = vor.u32 %v1578_v14, %v1273_v13  ;;  %v1369_v22 = vld [vmem:[#allocation5 + $0x230] sm:$0xf]  ;;  %v1545_v41 = vld [vmem:[#allocation5 + $0x70] sm:$0xf0]  ;;  %v1237_v43 = vld [vmem:[#allocation5 + $0x128] sm:$0xf] }
  0x44   :  { %812 = vmatpush.bf16.msrb.mxu1 %v1234_v23  ;;  %v1261_v23 = vld [vmem:[#allocation5 + $0x158] sm:$0xf]  ;;  %v1370_v26 = vor.u32 %v1602_v25, %v1369_v22  ;;  %v1465_v32 = vld [vmem:[#allocation5 + $0x2f0] sm:$0xf]  ;;  %v1623_v45 = vld [vmem:[#allocation5 + $0x2e0] sm:$0xf0] }
  0x45   :  { %825 = vmatpush.bf16.msrb.mxu2 %v1330_v24  ;;  %v1575_v24 = vld [vmem:[#allocation5 + $0x160] sm:$0xf0]  ;;  %v1466_v35 = vor.u32 %v1626_v33, %v1465_v32  ;;  %v1453_v44 = vld [vmem:[#allocation5 + $0x2d8] sm:$0xf]  ;;  %v1596_v49 = vld [vmem:[#allocation5 + $0x208] sm:$0xf0] }
  0x46   :  { %838 = vmatpush.bf16.msrb.mxu3 %v1426_v28  ;;  %v1153_v28 = vld [vmem:[#allocation5 + $0x80] sm:$0xf]  ;;  %v1262_v30 = vor.u32 %v1575_v24, %v1261_v23  ;;  %v1542_v53 = vld [vmem:[#allocation5 + $0x58] sm:$0xf0]  ;;  %v1225_v55 = vld [vmem:[#allocation5 + $0x110] sm:$0xf] }
  0x47   :  { %800 = vmatpush.bf16.msrb.mxu0 %v1126_v34  ;;  %v1572_v34 = vld [vmem:[#allocation5 + $0x148] sm:$0xf0]  ;;  %v1154_v39 = vor.u32 %v1548_v29, %v1153_v28  ;;  %v1441_v57 = vld [vmem:[#allocation5 + $0x2c0] sm:$0xf]  ;;  %v1117_v4 = vld [vmem:[#allocation5 + $0x38] sm:$0xf] }
  0x48   :  { %813 = vmatpush.bf16.msrb.mxu1 %v1222_v36  ;;  %v1357_v36 = vld [vmem:[#allocation5 + $0x218] sm:$0xf]  ;;  %v1250_v42 = vor.u32 %v1572_v34, %v1249_v31  ;;  %v1620_v58 = vld [vmem:[#allocation5 + $0x2c8] sm:$0xf0]  ;;  %v1563_v8 = vld [vmem:[#allocation5 + $0x100] sm:$0xf0] }
  0x49   :  { %826 = vmatpush.bf16.msrb.mxu2 %v1318_v37  ;;  %v1599_v37 = vld [vmem:[#allocation5 + $0x220] sm:$0xf0]  ;;  %v1442_v63 = vor.u32 %v1620_v58, %v1441_v57  ;;  %v1213_v7 = vld [vmem:[#allocation5 + $0xf8] sm:$0xf]  ;;  %v1105_v10 = vld [vmem:[#allocation5 + $0x20] sm:$0xf] }
  0x4a   :  { %839 = vmatpush.bf16.msrb.mxu3 %v1414_v40  ;;  %v1358_v38 = vor.u32 %v1599_v37, %v1357_v36  ;;  %v1141_v40 = vld [vmem:[#allocation5 + $0x68] sm:$0xf]  ;;  %v1536_v11 = vld [vmem:[#allocation5 + $0x28] sm:$0xf0]  ;;  %v1617_v23 = vld [vmem:[#allocation5 + $0x2b0] sm:$0xf0] }
  0x4b   :  { %801 = vmatpush.bf16.msrb.mxu0 %v1114_v46  ;;  %v1569_v46 = vld [vmem:[#allocation5 + $0x130] sm:$0xf0]  ;;  %v1142_v51 = vor.u32 %v1545_v41, %v1141_v40  ;;  %v1106_v13 = vor.u32 %v1536_v11, %v1105_v10  ;;  %v1093_v14 = vld [vmem:[#allocation5 + $0x8] sm:$0xf]  ;;  %v1632_v19 = vld [vmem:[#allocation8 + $0x28] sm:$0xff]  ;;  %s1071_s19 = sshll.u32 %s1863_s5, 4  ;;  %s1072_s19 = int_to_ptr.hbm [resolvable:$true] %s1071_s19 }
  0x4c   :  { %814 = vmatpush.bf16.msrb.mxu1 %v1210_v47  ;;  %v1454_v47 = vor.u32 %v1623_v45, %v1453_v44  ;;  %v1238_v54 = vor.u32 %v1569_v46, %v1237_v43  ;;  %v1631_v20 = vld [vmem:[#allocation8 + $0x20] sm:$0xff]  ;;  %v1201_v24 = vld [vmem:[#allocation5 + $0xe0] sm:$0xf]  ;;  %v1321_v28 = vld [vmem:[#allocation5 + $0x1d0] sm:$0xf] }
  0x4d   :  { %827 = vmatpush.bf16.msrb.mxu2 %v1306_v48  ;;  %v1345_v48 = vld [vmem:[#allocation5 + $0x200] sm:$0xf]  ;;  %v1429_v22 = vld [vmem:[#allocation5 + $0x2a8] sm:$0xf]  ;;  %v1590_v29 = vld [vmem:[#allocation5 + $0x1d8] sm:$0xf0] }
  0x4e   :  { %840 = vmatpush.bf16.msrb.mxu3 %v1402_v52  ;;  %v1346_v50 = vor.u32 %v1596_v49, %v1345_v48  ;;  %v1129_v52 = vld [vmem:[#allocation5 + $0x50] sm:$0xf]  ;;  %v1430_v25 = vor.u32 %v1617_v23, %v1429_v22  ;;  %v1322_v31 = vor.u32 %v1590_v29, %v1321_v28  ;;  %v1614_v32 = vld [vmem:[#allocation5 + $0x298] sm:$0xf0]  ;;  %v1189_v33 = vld [vmem:[#allocation5 + $0xc8] sm:$0xf] }
  0x4f   :  { %802 = vmatpush.bf16.msrb.mxu0 %v1102_v61  ;;  %v1566_v61 = vld [vmem:[#allocation5 + $0x118] sm:$0xf0]  ;;  %v1130_v3 = vor.u32 %v1542_v53, %v1129_v52  ;;  %v1309_v37 = vld [vmem:[#allocation5 + $0x1b8] sm:$0xf]  ;;  %v1628_v40 = vld [vmem:[#allocation8 + $0x8] sm:$0xff] }
  0x50   :  { %815 = vmatpush.bf16.msrb.mxu1 %v1198_v0  ;;  %v1333_v0 = vld [vmem:[#allocation5 + $0x1e8] sm:$0xf]  ;;  %v1226_v6 = vor.u32 %v1566_v61, %v1225_v55  ;;  %v1642_v41 = vld [vmem:[#allocation8 + $0x78] sm:$0xff]  ;;  %v1611_v43 = vld [vmem:[#allocation5 + $0x280] sm:$0xf0] }
  0x51   :  { %828 = vmatpush.bf16.msrb.mxu2 %v1294_v1  ;;  %v1593_v1 = vld [vmem:[#allocation5 + $0x1f0] sm:$0xf0]  ;;  %v1297_v44 = vld [vmem:[#allocation5 + $0x1a0] sm:$0xf]  ;;  %v1584_v45 = vld [vmem:[#allocation5 + $0x1a8] sm:$0xf0] }
  0x52   :  { %841 = vmatpush.bf16.msrb.mxu3 %v1390_v5  ;;  %v1334_v2 = vor.u32 %v1593_v1, %v1333_v0  ;;  %v1539_v5 = vld [vmem:[#allocation5 + $0x40] sm:$0xf0]  ;;  %v1641_v49 = vld [vmem:[#allocation8 + $0x70] sm:$0xff]  ;;  %v1285_v52 = vld [vmem:[#allocation5 + $0x188] sm:$0xf] }
  0x53   :  { %803 = vmatpush.bf16.msrb.mxu0 %v1090_v12  ;;  %v1118_v9 = vor.u32 %v1539_v5, %v1117_v4  ;;  %v1214_v12 = vor.u32 %v1563_v8, %v1213_v7  ;;  %v1627_v48 = vld [vmem:[#allocation8] sm:$0xff]  ;;  %v1581_v53 = vld [vmem:[#allocation5 + $0x190] sm:$0xf0]  ;;  %v210_v0 = vld [vmem:[#allocation7] sm:$0x7] }
  0x54   :  { %816 = vmatpush.bf16.msrb.mxu1 %v1186_v15  ;;  %v1533_v15 = vld [vmem:[#allocation5 + $0x10] sm:$0xf0]  ;;  %v1381_v55 = vld [vmem:[#allocation5 + $0x248] sm:$0xf]  ;;  %v1286_v58 = vor.u32 %v1581_v53, %v1285_v52  ;;  %v1638_v1 = vld [vmem:[#allocation8 + $0x58] sm:$0xff] }
  0x55   :  { %829 = vmatpush.bf16.msrb.mxu2 %v1282_v16  ;;  %v1094_v16 = vor.u32 %v1533_v15, %v1093_v14  ;;  %v1605_v57 = vld [vmem:[#allocation5 + $0x250] sm:$0xf0]  ;;  %v1636_v8 = vld [vmem:[#allocation8 + $0x48] sm:$0xff] }
  0x56   :  { %842 = vmatpush.bf16.msrb.mxu3 %v1378_v17  ;;  %804 = vmatmul.bf16.vlgmr.msrb.gmra.mxu0 %v1834_v59  ;;  %v1634_v17 = vld [vmem:[#allocation8 + $0x38] sm:$0xff]  ;;  %v1382_v61 = vor.u32 %v1605_v57, %v1381_v55 }
  0x57   :  { %848 = vmatpush.bf16.msra.mxu0 %v1178_v18  ;;  %817 = vmatmul.bf16.vlgmr.msrb.gmra.mxu1 %v1838_v62  ;;  %v1633_v18 = vld [vmem:[#allocation8 + $0x30] sm:$0xff] }
  0x58   :  { %861 = vmatpush.bf16.msra.mxu1 %v1274_v21  ;;  %830 = vmatmul.bf16.vlgmr.msrb.gmra.mxu2 %v1832_v56  ;;  %v1630_v21 = vld [vmem:[#allocation8 + $0x18] sm:$0xff] }
  0x59   :  { %843 = vmatmul.bf16.vlgmr.msrb.gmra.mxu3 %v1836_v60  ;;  %874 = vmatpush.bf16.msra.mxu2 %v1370_v26  ;;  %v1560_v26 = vld [vmem:[#allocation5 + $0xe8] sm:$0xf0] }
  0x5a   :  { %887 = vmatpush.bf16.msra.mxu3 %v1466_v35  ;;  %v1557_v35 = vld [vmem:[#allocation5 + $0xd0] sm:$0xf0] }
  0x5b   :  { %849 = vmatpush.bf16.msra.mxu0 %v1166_v27  ;;  %v1202_v27 = vor.u32 %v1560_v26, %v1201_v24  ;;  %v1190_v36 = vor.u32 %v1557_v35, %v1189_v33 }
  0x5c   :  { %862 = vmatpush.bf16.msra.mxu1 %v1262_v30  ;;  %v1629_v30 = vld [vmem:[#allocation8 + $0x10] sm:$0xff] }
  0x5d   :  { %875 = vmatpush.bf16.msra.mxu2 %v1358_v38  ;;  %v1587_v38 = vld [vmem:[#allocation5 + $0x1c0] sm:$0xf0] }
  0x5e   :  { %888 = vmatpush.bf16.msra.mxu3 %v1454_v47  ;;  %v1298_v47 = vor.u32 %v1584_v45, %v1297_v44  ;;  %v1652_v45 = vld [vmem:[%s1862_s4] ss:$0 sm:$0xff] }
  0x5f   :  { %850 = vmatpush.bf16.msra.mxu0 %v1154_v39  ;;  %v1310_v39 = vor.u32 %v1587_v38, %v1309_v37 }
  0x60   :  { %863 = vmatpush.bf16.msra.mxu1 %v1250_v42  ;;  %v1405_v42 = vld [vmem:[#allocation5 + $0x278] sm:$0xf] }
  0x61   :  { %876 = vmatpush.bf16.msra.mxu2 %v1346_v50  ;;  %v1406_v46 = vor.u32 %v1611_v43, %v1405_v42  ;;  %v1393_v50 = vld [vmem:[#allocation5 + $0x260] sm:$0xf]  ;;  %v214_v42 = vperm.slane %v210_v0, 2 }
  0x62   :  { %889 = vmatpush.bf16.msra.mxu3 %v1442_v63  ;;  %v1639_v63 = vld [vmem:[#allocation8 + $0x60] sm:$0xff] }
  0x63   :  { %851 = vmatpush.bf16.msra.mxu0 %v1142_v51  ;;  %v1608_v51 = vld [vmem:[#allocation5 + $0x268] sm:$0xf0] }
  0x64   :  { %864 = vmatpush.bf16.msra.mxu1 %v1238_v54  ;;  %v1394_v54 = vor.u32 %v1608_v51, %v1393_v50 }
  0x65   :  { %877 = vmatpush.bf16.msra.mxu2 %v1334_v2  ;;  %v212_v2 = vperm.slane %v210_v0, 0 }
  0x66   :  { %890 = vmatpush.bf16.msra.mxu3 %v1430_v25 }
  0x67   :  { %852 = vmatpush.bf16.msra.mxu0 %v1130_v3  ;;  %v1637_v3 = vld [vmem:[#allocation8 + $0x50] sm:$0xff] }
  0x68   :  { %865 = vmatpush.bf16.msra.mxu1 %v1226_v6 }
  0x69   :  { %878 = vmatpush.bf16.msra.mxu2 %v1322_v31 }
  0x6b   :  { %853 = vmatpush.bf16.msra.mxu0 %v1118_v9 }
  0x6c   :  { %866 = vmatpush.bf16.msra.mxu1 %v1214_v12 }
  0x6d   :  { %879 = vmatpush.bf16.msra.mxu2 %v1310_v39 }
  0x6f   :  { %854 = vmatpush.bf16.msra.mxu0 %v1106_v13  ;;  %v1635_v13 = vld [vmem:[#allocation8 + $0x40] sm:$0xff] }
  0x70   :  { %867 = vmatpush.bf16.msra.mxu1 %v1202_v27 }
  0x71   :  { %880 = vmatpush.bf16.msra.mxu2 %v1298_v47 }
  0x73   :  { %855 = vmatpush.bf16.msra.mxu0 %v1094_v16 }
  0x74   :  { %868 = vmatpush.bf16.msra.mxu1 %v1190_v36 }
  0x75   :  { %881 = vmatpush.bf16.msra.mxu2 %v1286_v58 }
  0x76   :  { %856 = vmatmul.bf16.vlgmr.msra.gmra.mxu0 %v1834_v59  ;;  %v1417_v59 = vld [vmem:[#allocation5 + $0x290] sm:$0xf] }
  0x77   :  { %1036 = vmatpush.bf16.msrb.mxu0 %v1634_v17  ;;  %v1418_v34 = vor.u32 %v1614_v32, %v1417_v59  ;;  %869 = vmatmul.bf16.vlgmr.msra.gmra.mxu1 %v1838_v62  ;;  %v1640_v62 = vld [vmem:[#allocation8 + $0x68] sm:$0xff] }
  0x78   :  { %1049 = vmatpush.bf16.msrb.mxu1 %v1642_v41  ;;  %882 = vmatmul.bf16.vlgmr.msra.gmra.mxu2 %v1832_v56 }
  0x79   :  { %891 = vmatpush.bf16.msra.mxu3 %v1418_v34 }
  0x7b   :  { %1037 = vmatpush.bf16.msrb.mxu0 %v1633_v18  ;;  %v213_v18 = vperm.slane %v210_v0, 1 }
  0x7c   :  { %1050 = vmatpush.bf16.msrb.mxu1 %v1641_v49 }
  0x7d   :  { %892 = vmatpush.bf16.msra.mxu3 %v1406_v46 }
  0x7f   :  { %1038 = vmatpush.bf16.msrb.mxu0 %v1632_v19 }
  0x80   :  { %1051 = vmatpush.bf16.msrb.mxu1 %v1640_v62 }
  0x81   :  { %893 = vmatpush.bf16.msra.mxu3 %v1394_v54 }
  0x83   :  { %1039 = vmatpush.bf16.msrb.mxu0 %v1631_v20 }
  0x84   :  { %1052 = vmatpush.bf16.msrb.mxu1 %v1639_v63 }
  0x85   :  { %894 = vmatpush.bf16.msra.mxu3 %v1382_v61 }
  0x87   :  { %1040 = vmatpush.bf16.msrb.mxu0 %v1630_v21 }
  0x88   :  { %895 = vmatmul.bf16.vlgmr.msra.gmra.mxu3 %v1836_v60  ;;  %1053 = vmatpush.bf16.msrb.mxu1 %v1638_v1 }
  0x8b   :  { %1041 = vmatpush.bf16.msrb.mxu0 %v1629_v30 }
  0x8c   :  { %1054 = vmatpush.bf16.msrb.mxu1 %v1637_v3 }
  0x8f   :  { %1042 = vmatpush.bf16.msrb.mxu0 %v1628_v40 }
  0x90   :  { %1055 = vmatpush.bf16.msrb.mxu1 %v1636_v8 }
  0x93   :  { %1043 = vmatpush.bf16.msrb.mxu0 %v1627_v48 }
  0x94   :  { %1056 = vmatpush.bf16.msrb.mxu1 %v1635_v13 }
  0xb3   :  { %v753_v4 = vpop.f32.mrf.mxu0 }
  0xb4   :  { %v754_v5 = vadd.f32 %v753_v4, %v212_v2  ;;  %v766_v6 = vpop.f32.mrf.mxu1 }
  0xb6   :  { %v767_v7 = vadd.f32 %v766_v6, %v754_v5 }
  0xbb   :  { %v779_v9 = vpop.f32.mrf.mxu2  ;;  %v755_v56 = vpop.f32.mrf.mxu0 }
  0xbc   :  { %v780_v10 = vadd.f32 %v779_v9, %v767_v7  ;;  %v792_v11 = vpop.f32.mrf.mxu3  ;;  %v768_v14 = vpop.f32.mrf.mxu1 }
  0xbe   :  { %v793_v12 = vadd.f32 %v792_v11, %v780_v10 }
  0xc0   :  { %v900_v15 = vmax.f32 %v793_v12, 0.0 }
  0xc2   :  { %v902_v60 = vpack.c.bf16 %v900_v15, %v900_v15 }
  0xc3   :  { %v781_v16 = vpop.f32.mrf.mxu2 }
  0xc4   :  { %1044 = vmatmul.bf16.vlgmr.msrb.gmra.mxu0 %v902_v60  ;;  %v794_v17 = vpop.f32.mrf.mxu3 }
  0xd3   :  { %v805_v19 = vpop.f32.mrf.mxu0 }
  0xd4   :  { %v806_v20 = vadd.f32 %v805_v19, %v213_v18  ;;  %v818_v21 = vpop.f32.mrf.mxu1 }
  0xd6   :  { %v819_v22 = vadd.f32 %v818_v21, %v806_v20 }
  0xdb   :  { %v831_v23 = vpop.f32.mrf.mxu2  ;;  %v807_v26 = vpop.f32.mrf.mxu0 }
  0xdc   :  { %v832_v24 = vadd.f32 %v831_v23, %v819_v22  ;;  %v844_v25 = vpop.f32.mrf.mxu3  ;;  %v820_v27 = vpop.f32.mrf.mxu1 }
  0xde   :  { %v845_v28 = vadd.f32 %v844_v25, %v832_v24 }
  0xe0   :  { %v901_v29 = vmax.f32 %v845_v28, 0.0 }
  0xe2   :  { %v903_v30 = vpack.c.bf16 %v901_v29, %v901_v29 }
  0xe3   :  { %v833_v31 = vpop.f32.mrf.mxu2 }
  0xe4   :  { %v846_v59 = vpop.f32.mrf.mxu3  ;;  %1057 = vmatmul.bf16.vlgmr.msrb.gmra.mxu1 %v903_v30 }
  0xf3   :  { %v857_v32 = vpop.f32.mrf.mxu0 }
  0xf4   :  { %v870_v34 = vpop.f32.mrf.mxu1  ;;  %v858_v43 = vadd.f32 %v857_v32, %v214_v42 }
  0xf6   :  { %v871_v44 = vadd.f32 %v870_v34, %v858_v43 }
  0xfb   :  { %v859_v33 = vpop.f32.mrf.mxu0  ;;  %v883_v36 = vpop.f32.mrf.mxu2 }
  0xfc   :  { %v872_v35 = vpop.f32.mrf.mxu1  ;;  %v884_v46 = vadd.f32 %v883_v36, %v871_v44 }
 0x103   :  { %v885_v38 = vpop.f32.mrf.mxu2 }
 0x10b   :  { %v896_v37 = vpop.f32.mrf.mxu3 }
 0x10c   :  { %v897_v49 = vadd.f32 %v896_v37, %v884_v46 }
 0x113   :  { %v898_v39 = vpop.f32.mrf.mxu3 }
 0x141   :  { %v1045_v40 = vpop.f32.mrf.mxu0 }
 0x142   :  { %v1046_v47 = vadd.f32 %v1652_v45, %v1045_v40 }
 0x149   :  { %v1047_v41 = vpop.f32.mrf.mxu0 }
 0x161   :  { %v1058_v48 = vpop.f32.mrf.mxu1 }
 0x162   :  { %v1059_v50 = vadd.f32 %v1058_v48, %v1046_v47 }
 0x164   :  { %v1062_v51 = vadd.f32 %v1059_v50, %v897_v49 }
 0x166   :  { %1063 = vst [vmem:[#allocation10] sm:$0xff] %v1062_v51 }
 0x167   :  { %1074 = dma.vmem_to_hbm [thread:$0]  %s1070_s16, 128, %s1072_s19, [#allocation4]  }
 0x169   :  { %v1060_v52 = vpop.f32.mrf.mxu1 }
 0x16a   :  { %1779 = dma.done.wait [#allocation4], 128  }
 0x16b   :  { %1780 = vsyncadd [#allocation4], 4294967168 }
 0x16c   :  { %1079 = vsyncpa [#allocation3], 1 }
 0x16d   :  { %1080 = vsyncpa [#allocation6], 1 }
 0x16e   :  { %1081 = vsyncpa [#allocation9], 1 }
 0x16f   :  { %1082 = vsyncpa [#allocation4], 1 }

</bundles_post_ra>
